<compile_context>
chip_gen: v6e
topology: v6e:2x2x1
jax: 0.10.0
libtpu: 0.0.40
codegen_flags: <defaults>
</compile_context>

<pallas_src>
import jax
import jax.numpy as jnp
from jax.experimental import pallas as pl
from jax.experimental.pallas import tpu as pltpu


def _mlp_kernel(x_ref, w1_ref, b1_ref, w2_ref, b2_ref, o_ref):
    # Biases read once per invocation (broadcast over rows by the VPU).
    b1 = b1_ref[...]          # (1, Dp_h)
    b2 = b2_ref[...]          # (1, Dp_out)

    # Hidden layer: x @ W1 + b1, ReLU  (MXU matmul, f32 accumulate).
    h = jnp.dot(x_ref[...], w1_ref[...], preferred_element_type=jnp.float32)
    h = jnp.maximum(h + b1, 0.0)

    # Output layer: h @ W2 + b2.
    y = jnp.dot(h, w2_ref[...], preferred_element_type=jnp.float32)
    o_ref[...] = (y + b2).astype(o_ref.dtype)


def _round_up(n, m):
    return ((n + m - 1) // m) * m


def _pack_factor(batch, max_pack):
    for p in (8, 4, 2, 1):
        if p <= max_pack and batch % p == 0:
            return p
    return 1


def _pack_params(w1, b1, w2, b2, p):
    """Block-diagonal weights / tiled biases so P rows process as one packed row."""
    d_h = w1.shape[1]
    d_out = w2.shape[1]
    if p == 1:
        return w1, b1.reshape(1, d_h), w2, b2.reshape(1, d_out)
    eye = jnp.eye(p, dtype=w1.dtype)
    w1p = jnp.kron(eye, w1)                       # (P*D_in, P*D_h), block-diagonal
    w2p = jnp.kron(eye.astype(w2.dtype), w2)      # (P*D_h, P*D_out)
    b1p = jnp.tile(b1, p).reshape(1, p * d_h)
    b2p = jnp.tile(b2, p).reshape(1, p * d_out)
    return w1p, b1p, w2p, b2p


def generator_forward(x, w1, b1, w2, b2, *,
                      pack=8,
                      max_resident_rows=8192,
                      block_rows_packed=None,
                      target_block_bytes=2 << 20):
    """x: [B, D_in] f32; w1: [D_in, 16]; w2: [16, D_out]. Returns [B, D_out] f32."""
    B, D_in = x.shape
    D_h = w1.shape[1]
    D_out = w2.shape[1]

    # Lane-dense packing (free reshape; exact math via block-diagonal weights).
    P = _pack_factor(B, pack)
    Bp = B // P
    Dp_in, Dp_h, Dp_out = P * D_in, P * D_h, P * D_out
    xp = x.reshape(Bp, Dp_in)
    w1p, b1p, w2p, b2p = _pack_params(w1, b1, w2, b2, P)

    if B <= max_resident_rows:
        # Small / mid batch: single invocation, everything resident in VMEM,
        # no grid and no software-pipeline machinery.
        out = pl.pallas_call(
            _mlp_kernel,
            out_shape=jax.ShapeDtypeStruct((Bp, Dp_out), jnp.float32),
            in_specs=[pl.BlockSpec(memory_space=pltpu.MemorySpace.VMEM)] * 5,
            out_specs=pl.BlockSpec(memory_space=pltpu.MemorySpace.VMEM),
        )(xp, w1p, b1p, w2p, b2p)
        return out.reshape(B, D_out)

    # Large batch: tile over packed rows.  Tile sized to ~target_block_bytes
    # of x per step, capped so the grid always has >= 2 tiles (v7x megacore).
    if block_rows_packed is None:
        row_bytes = Dp_in * 4
        tb = _round_up(max(target_block_bytes // row_bytes, 8), 8)
        tb = min(tb, _round_up(pl.cdiv(Bp, 2), 8))
    else:
        tb = _round_up(block_rows_packed, 8)
    tb = max(8, min(tb, _round_up(Bp, 8)))
    num_tiles = pl.cdiv(Bp, tb)   # last tile may be partial -> clipped writeback

    out = pl.pallas_call(
        _mlp_kernel,
        out_shape=jax.ShapeDtypeStruct((Bp, Dp_out), jnp.float32),
        grid_spec=pltpu.PrefetchScalarGridSpec(
            num_scalar_prefetch=0,
            grid=(num_tiles,),
            in_specs=[
                # x: one (tb, Dp_in) row-tile per grid step.
                pl.BlockSpec((tb, Dp_in), lambda i: (i, 0)),
                # Weights / biases: constant index_map -> fetched once,
                # VMEM-resident, never re-DMA'd per tile.
                pl.BlockSpec((Dp_in, Dp_h), lambda i: (0, 0)),
                pl.BlockSpec((1, Dp_h), lambda i: (0, 0)),
                pl.BlockSpec((Dp_h, Dp_out), lambda i: (0, 0)),
                pl.BlockSpec((1, Dp_out), lambda i: (0, 0)),
            ],
            out_specs=pl.BlockSpec((tb, Dp_out), lambda i: (i, 0)),
        ),
        compiler_params=pltpu.CompilerParams(
            # Independent batch tiles -> shard across TensorCores.
            dimension_semantics=("parallel",),
        ),
    )(xp, w1p, b1p, w2p, b2p)

    return out.reshape(B, D_out)


def reference_forward(x, w1, b1, w2, b2):
    h = jnp.maximum(x @ w1 + b1, 0.0)
    return h @ w2 + b2


if __name__ == "__main__":
    D_in = 32      # input_dim
    D_hidden = 16  # fixed by the module definition
    D_out = 32     # output_dim

    key = jax.random.PRNGKey(0)
    kx, k1, kb1, k2, kb2, kx2, kx3 = jax.random.split(key, 7)

    # Deterministic synthetic parameters (pre-transposed to [in, out]).
    bound1 = 1.0 / jnp.sqrt(D_in)
    w1 = jax.random.uniform(k1, (D_in, D_hidden), jnp.float32, -bound1, bound1)
    b1 = jax.random.uniform(kb1, (D_hidden,), jnp.float32, -bound1, bound1)
    bound2 = 1.0 / jnp.sqrt(D_hidden)
    w2 = jax.random.uniform(k2, (D_hidden, D_out), jnp.float32, -bound2, bound2)
    b2 = jax.random.uniform(kb2, (D_out,), jnp.float32, -bound2, bound2)

    # 1) Small batch: single invocation, P=8 lane-dense packing (256 lanes).
    x_a = jax.random.normal(kx, (8, D_in), dtype=jnp.float32)
    out_a = jax.block_until_ready(generator_forward(x_a, w1, b1, w2, b2))
    assert out_a.shape == (8, D_out)
    assert jnp.allclose(out_a, reference_forward(x_a, w1, b1, w2, b2),
                        atol=1e-5, rtol=1e-5)

    # 2) Batch not divisible by 8 -> smaller pack factor, still no pad/slice.
    x_b = jax.random.normal(kx2, (10, D_in), dtype=jnp.float32)
    out_b = jax.block_until_ready(generator_forward(x_b, w1, b1, w2, b2))
    assert out_b.shape == (10, D_out)
    assert jnp.allclose(out_b, reference_forward(x_b, w1, b1, w2, b2),
                        atol=1e-5, rtol=1e-5)

    # 3) Grid path (forced with a tiny residency threshold to keep the test
    #    small): multiple parallel batch tiles, weights resident, partial last
    #    tile handled by clipped writeback -- no jnp.pad / out[:B] round trip.
    x_c = jax.random.normal(kx3, (1000, D_in), dtype=jnp.float32)
    out_c = jax.block_until_ready(
        generator_forward(x_c, w1, b1, w2, b2,
                          max_resident_rows=64, block_rows_packed=48))
    assert out_c.shape == (1000, D_out)
    assert jnp.allclose(out_c, reference_forward(x_c, w1, b1, w2, b2),
                        atol=1e-5, rtol=1e-5)

    print("KERNEL_OK")
</pallas_src>

<mosaic_0001>
module attributes {stable_mosaic.version = 11 : i64} {
  func.func @_mlp_kernel(%arg0: memref<1x256xf32, #tpu.memory_space<vmem>>, %arg1: memref<256x128xf32, #tpu.memory_space<vmem>>, %arg2: memref<1x128xf32, #tpu.memory_space<vmem>>, %arg3: memref<128x256xf32, #tpu.memory_space<vmem>>, %arg4: memref<1x256xf32, #tpu.memory_space<vmem>>, %arg5: memref<1x256xf32, #tpu.memory_space<vmem>>) attributes {dimension_semantics = [], scalar_prefetch = 0 : i64, scratch_operands = 0 : i64, tpu.core_type = #tpu.core_type<tc>} {
    %c0 = arith.constant 0 : index
    %c0_0 = arith.constant 0 : index
    %0 = vector.load %arg2[%c0, %c0_0] : memref<1x128xf32, #tpu.memory_space<vmem>>, vector<1x128xf32>
    %c0_1 = arith.constant 0 : index
    %c0_2 = arith.constant 0 : index
    %1 = vector.load %arg4[%c0_1, %c0_2] : memref<1x256xf32, #tpu.memory_space<vmem>>, vector<1x256xf32>
    %c0_3 = arith.constant 0 : index
    %c0_4 = arith.constant 0 : index
    %2 = vector.load %arg0[%c0_3, %c0_4] : memref<1x256xf32, #tpu.memory_space<vmem>>, vector<1x256xf32>
    %c0_5 = arith.constant 0 : index
    %c0_6 = arith.constant 0 : index
    %3 = vector.load %arg1[%c0_5, %c0_6] : memref<256x128xf32, #tpu.memory_space<vmem>>, vector<256x128xf32>
    %cst = arith.constant dense<0.000000e+00> : vector<1x128xf32>
    %4 = tpu.matmul %2, %3, %cst {dimension_numbers = #tpu.dot_dimension_numbers<[1], [0], [0], [1], [0, 0, 1, 1], [], []>} : vector<1x256xf32>, vector<256x128xf32>, vector<1x128xf32> -> vector<1x128xf32>
    %5 = arith.addf %4, %0 : vector<1x128xf32>
    %cst_7 = arith.constant 0.000000e+00 : f32
    %6 = vector.broadcast %cst_7 : f32 to vector<1x128xf32>
    %7 = arith.maximumf %5, %6 : vector<1x128xf32>
    %c0_8 = arith.constant 0 : index
    %c0_9 = arith.constant 0 : index
    %8 = vector.load %arg3[%c0_8, %c0_9] : memref<128x256xf32, #tpu.memory_space<vmem>>, vector<128x256xf32>
    %cst_10 = arith.constant dense<0.000000e+00> : vector<1x256xf32>
    %9 = tpu.matmul %7, %8, %cst_10 {dimension_numbers = #tpu.dot_dimension_numbers<[1], [0], [0], [1], [0, 0, 1, 1], [], []>} : vector<1x128xf32>, vector<128x256xf32>, vector<1x256xf32> -> vector<1x256xf32>
    %10 = arith.addf %9, %1 : vector<1x256xf32>
    %c0_11 = arith.constant 0 : index
    %c0_12 = arith.constant 0 : index
    %11 = vector.load %arg5[%c0_11, %c0_12] : memref<1x256xf32, #tpu.memory_space<vmem>>, vector<1x256xf32>
    tpu.vector_store %arg5[%c0_11, %c0_12], %10 {strides = array<i32>} : memref<1x256xf32, #tpu.memory_space<vmem>>, vector<1x256xf32>,
    return
  }
}

</mosaic_0001>

<bundles_post_ra>
// kernel: tpu_custom_call.1
= control target key start
LH: loop header
LB: loop body
LE: loop exit
PB: predicated region body
PF: predicated region fallthrough
CT: control target
= control target key end

     0   :  { %10 = vsyncpa [#allocation3], 0  ;;  %s538_s0 = inlined_call_operand.hbm [shape: f32[1,256], index: 0, kind: input, shape index: {}]   ;;  %s539_s1 = inlined_call_operand.hbm [shape: f32[256,128], index: 1, kind: input, shape index: {}]   ;;  %s540_s2 = inlined_call_operand.vmem [shape: f32[1,128], index: 2, kind: input, shape index: {}]   ;;  %s541_s3 = inlined_call_operand.hbm [shape: f32[128,256], index: 3, kind: input, shape index: {}]   ;;  %s542_s4 = inlined_call_operand.vmem [shape: f32[1,256], index: 4, kind: input, shape index: {}]   ;;  %s543_s5 = inlined_call_operand.hbm [shape: f32[1,256], index: 5, kind: output, shape index: {}]  }
   0x1   :  { %11 = vsyncpa [#allocation6], 0 }
   0x2   :  { %12 = vsyncpa [#allocation4], 0  ;;  %s461_s18 = smov [#allocation5]  }
   0x3   :  { %s28_s19 = sshll.u32 %s461_s18, 4  ;;  %s29_s19 = int_to_ptr.vmem [resolvable:$true] %s28_s19 }
   0x4   :  { %s383_s20 = scalar_lea.vmem %s29_s19, 4096  ;;  %p388_p1 = scmp.lt.s32.totalorder %s29_s19, %s29_s19 }
   0x5   :  { %p384_p0 = scmp.ne.s32.totalorder %s29_s19, %s383_s20  ;;  %p389_p2 = scmp.lt.s32.totalorder %s383_s20, %s383_s20 }
   0x7   :  { %p390_p3 = por %p389_p2, %p388_p1 }
   0x9   :  { %p391_p4 = pnand %p390_p3, %p384_p0 }
   0xb   :  { %394 = shalt.err (!%p391_p4)
}
   0xc   :  { %s462_s21 = smov 128   ;;  %s463_s22 = smov 8  }
   0xd   :  { %34 = dma.hbm_to_vmem [thread:$0]  %s539_s1, 4096, %s29_s19, [#allocation6], %s462_s21, %s462_s21, %s463_s22  }
   0xe   :  { %s464_s25 = smov [#allocation2]   ;;  %s465_s27 = smov [#allocation7]  }
   0xf   :  { %s19_s26 = sshll.u32 %s464_s25, 4  ;;  %s42_s28 = sshll.u32 %s465_s27, 4  ;;  %s20_s26 = int_to_ptr.vmem [resolvable:$true] %s19_s26  ;;  %s43_s28 = int_to_ptr.vmem [resolvable:$true] %s42_s28 }
  0x10   :  { %s403_s29 = scalar_lea.vmem %s20_s26, 32  ;;  %p408_p6 = scmp.lt.s32.totalorder %s20_s26, %s20_s26 }
  0x11   :  { %p404_p5 = scmp.ne.s32.totalorder %s20_s26, %s403_s29  ;;  %p409_p7 = scmp.lt.s32.totalorder %s403_s29, %s403_s29 }
  0x13   :  { %p410_p8 = por %p409_p7, %p408_p6 }
  0x15   :  { %p411_p9 = pnand %p410_p8, %p404_p5 }
  0x17   :  { %414 = shalt.err (!%p411_p9)
}
  0x18   :  { %22 = dma.hbm_to_vmem [thread:$0]  %s538_s0, 32, %s20_s26, [#allocation3]  }
  0x19   :  { %s423_s7 = scalar_lea.vmem %s43_s28, 4096  ;;  %p428_p11 = scmp.lt.s32.totalorder %s43_s28, %s43_s28 }
  0x1a   :  { %p424_p10 = scmp.ne.s32.totalorder %s43_s28, %s423_s7  ;;  %p429_p12 = scmp.lt.s32.totalorder %s423_s7, %s423_s7 }
  0x1c   :  { %p430_p13 = por %p429_p12, %p428_p11 }
  0x1e   :  { %p431_p0 = pnand %p430_p13, %p424_p10 }
  0x20   :  { %434 = shalt.err (!%p431_p0)
}
  0x21   :  { %s466_s1 = smov 256   ;;  %s467_s8 = smov 16  }
  0x22   :  { %48 = dma.hbm_to_vmem [thread:$0]  %s541_s3, 4096, %s43_s28, [#allocation6], %s466_s1, %s466_s1, %s467_s8  }
  0x23   :  { %455 = dma.done.wait [#allocation3], 32  }
  0x24   :  { %456 = vsyncadd [#allocation3], 4294967264 }
  0x25   :  { %457 = dma.done.wait [#allocation6], 8192  }
  0x26   :  { %458 = vsyncadd [#allocation6], 4294959104  ;;  %v96_v0 = vlaneseq  ;;  %v94_v1 = vld [vmem:[#allocation5 + $0xf8] sm:$0xff]  ;;  %v93_v3 = vld [vmem:[#allocation5 + $0xf0] sm:$0xff] }
  0x27   :  { %v78_v2 = vld [vmem:[#allocation5 + $0x78] sm:$0xff]  ;;  %330 = vmatprep.subr.mxu0 %v94_v1  ;;  %v77_v4 = vld [vmem:[#allocation5 + $0x70] sm:$0xff]  ;;  %v92_v5 = vld [vmem:[#allocation5 + $0xe8] sm:$0xff] }
  0x28   :  { %331 = vmatpush3.msra.mxu0 %v78_v2  ;;  %v76_v6 = vld [vmem:[#allocation5 + $0x68] sm:$0xff]  ;;  %v511_v7 = vshrl.u32 %v96_v0, 7  ;;  %v91_v8 = vld [vmem:[#allocation5 + $0xe0] sm:$0xff]  ;;  %v90_v10 = vld [vmem:[#allocation5 + $0xd8] sm:$0xff]  ;;  %vm311_vm0 = vcmp.lt.s32.totalorder %v96_v0, 256 }
  0x29   :  { %332 = vmatprep.subr.mxu0 %v93_v3  ;;  %v75_v9 = vld [vmem:[#allocation5 + $0x60] sm:$0xff]  ;;  %v74_v11 = vld [vmem:[#allocation5 + $0x58] sm:$0xff]  ;;  %v89_v13 = vld [vmem:[#allocation5 + $0xd0] sm:$0xff] }
  0x2a   :  { %333 = vmatpush3.msra.mxu0 %v77_v4  ;;  %v102_v12 = vsub.s32 1, %v511_v7  ;;  %v73_v14 = vld [vmem:[#allocation5 + $0x50] sm:$0xff]  ;;  %v88_v15 = vld [vmem:[#allocation5 + $0xc8] sm:$0xff]  ;;  %v514_v16 = vld [vmem:[#allocation2] sm:$0x3]  ;;  %v98_v48 = vsub.s32 0, %v511_v7 }
  0x2b   :  { %334 = vmatprep.subr.mxu0 %v92_v5  ;;  %v72_v17 = vld [vmem:[#allocation5 + $0x48] sm:$0xff]  ;;  %v208_v19 = vld [vmem:[#allocation7 + $0xf8] sm:$0xff]  ;;  %v207_v20 = vld [vmem:[#allocation7 + $0xf0] sm:$0xff] }
  0x2c   :  { %335 = vmatpush3.msra.mxu0 %v76_v6  ;;  %v103_v18 = vrot.slane %v514_v16, %v102_v12  ;;  %v87_v21 = vld [vmem:[#allocation5 + $0xc0] sm:$0xff]  ;;  %220 = vmatprep.subr.mxu1 %v208_v19  ;;  %v206_v22 = vld [vmem:[#allocation7 + $0xe8] sm:$0xff]  ;;  %v86_v25 = vld [vmem:[#allocation5 + $0xb8] sm:$0xff]  ;;  %v99_v57 = vrot.slane %v514_v16, %v98_v48 }
  0x2d   :  { %336 = vmatprep.subr.mxu0 %v91_v8  ;;  %v71_v23 = vld [vmem:[#allocation5 + $0x40] sm:$0xff]  ;;  %221 = vmatpush1.msra.mxu1 %v207_v20  ;;  %v204_v26 = vld [vmem:[#allocation7 + $0xd8] sm:$0xff]  ;;  %v203_v28 = vld [vmem:[#allocation7 + $0xd0] sm:$0xff] }
  0x2e   :  { %337 = vmatpush3.msra.mxu0 %v75_v9  ;;  %170 = vmatprep.mubr.f32.mxu0 %v103_v18  ;;  %v205_v24 = vld [vmem:[#allocation7 + $0xe0] sm:$0xff]  ;;  %v70_v27 = vld [vmem:[#allocation5 + $0x38] sm:$0xff]  ;;  %v85_v29 = vld [vmem:[#allocation5 + $0xb0] sm:$0xff]  ;;  %v468_v9 = vmov 0.0  }
  0x2f   :  { %338 = vmatprep.subr.mxu0 %v90_v10  ;;  %222 = vmatprep.subr.mxu1 %v206_v22  ;;  %v202_v30 = vld [vmem:[#allocation7 + $0xc8] sm:$0xff]  ;;  %v69_v31 = vld [vmem:[#allocation5 + $0x30] sm:$0xff]  ;;  %v201_v32 = vld [vmem:[#allocation7 + $0xc0] sm:$0xff] }
  0x30   :  { %339 = vmatpush3.msra.mxu0 %v74_v11  ;;  %223 = vmatpush1.msra.mxu1 %v205_v24  ;;  %v84_v33 = vld [vmem:[#allocation5 + $0xa8] sm:$0xff]  ;;  %v200_v34 = vld [vmem:[#allocation7 + $0xb8] sm:$0xff]  ;;  %v199_v36 = vld [vmem:[#allocation7 + $0xb0] sm:$0xff] }
  0x31   :  { %340 = vmatprep.subr.mxu0 %v89_v13  ;;  %224 = vmatprep.subr.mxu1 %v204_v26  ;;  %v68_v35 = vld [vmem:[#allocation5 + $0x28] sm:$0xff]  ;;  %v83_v37 = vld [vmem:[#allocation5 + $0xa0] sm:$0xff]  ;;  %v82_v41 = vld [vmem:[#allocation5 + $0x98] sm:$0xff] }
  0x32   :  { %341 = vmatpush3.msra.mxu0 %v73_v14  ;;  %225 = vmatpush1.msra.mxu1 %v203_v28  ;;  %v198_v38 = vld [vmem:[#allocation7 + $0xa8] sm:$0xff]  ;;  %v67_v39 = vld [vmem:[#allocation5 + $0x20] sm:$0xff]  ;;  %v196_v42 = vld [vmem:[#allocation7 + $0x98] sm:$0xff] }
  0x33   :  { %342 = vmatprep.subr.mxu0 %v88_v15  ;;  %226 = vmatprep.subr.mxu1 %v202_v30  ;;  %v197_v40 = vld [vmem:[#allocation7 + $0xa0] sm:$0xff]  ;;  %v66_v43 = vld [vmem:[#allocation5 + $0x18] sm:$0xff]  ;;  %v195_v44 = vld [vmem:[#allocation7 + $0x90] sm:$0xff] }
  0x34   :  { %343 = vmatpush3.msra.mxu0 %v72_v17  ;;  %227 = vmatpush1.msra.mxu1 %v201_v32  ;;  %v81_v45 = vld [vmem:[#allocation5 + $0x90] sm:$0xff]  ;;  %v194_v46 = vld [vmem:[#allocation7 + $0x88] sm:$0xff]  ;;  %v193_v49 = vld [vmem:[#allocation7 + $0x80] sm:$0xff]  ;;  %v469_v17 = vmov 1966171168  }
  0x35   :  { %344 = vmatprep.subr.mxu0 %v87_v21  ;;  %228 = vmatprep.subr.mxu1 %v200_v34  ;;  %v65_v47 = vld [vmem:[#allocation5 + $0x10] sm:$0xff]  ;;  %v80_v50 = vld [vmem:[#allocation5 + $0x88] sm:$0xff]  ;;  %v192_v51 = vld [vmem:[#allocation7 + $0x78] sm:$0xff]  ;;  %v295_v18 = vunpack.c.l.s4 %v469_v17 }
  0x36   :  { %345 = vmatpush3.msra.mxu0 %v71_v23  ;;  %229 = vmatpush1.msra.mxu1 %v199_v36  ;;  %v64_v52 = vld [vmem:[#allocation5 + $0x8] sm:$0xff]  ;;  %v191_v53 = vld [vmem:[#allocation7 + $0x70] sm:$0xff]  ;;  %v79_v54 = vld [vmem:[#allocation5 + $0x80] sm:$0xff] }
  0x37   :  { %346 = vmatprep.subr.mxu0 %v86_v25  ;;  %230 = vmatprep.subr.mxu1 %v198_v38  ;;  %v190_v55 = vld [vmem:[#allocation7 + $0x68] sm:$0xff]  ;;  %v63_v56 = vld [vmem:[#allocation5] sm:$0xff]  ;;  %v188_v59 = vld [vmem:[#allocation7 + $0x58] sm:$0xff]  ;;  %v296_v22 = vunpack.c.0.s8 %v295_v18 }
  0x38   :  { %347 = vmatpush3.msra.mxu0 %v70_v27  ;;  %231 = vmatpush1.msra.mxu1 %v197_v40  ;;  %v189_v58 = vld [vmem:[#allocation7 + $0x60] sm:$0xff]  ;;  %v187_v60 = vld [vmem:[#allocation7 + $0x50] sm:$0xff]  ;;  %v186_v61 = vld [vmem:[#allocation7 + $0x48] sm:$0xff] }
  0x39   :  { %348 = vmatprep.subr.mxu0 %v85_v29  ;;  %232 = vmatprep.subr.mxu1 %v196_v42  ;;  %v185_v62 = vld [vmem:[#allocation7 + $0x40] sm:$0xff]  ;;  %v184_v63 = vld [vmem:[#allocation7 + $0x38] sm:$0xff]  ;;  %v183_v1 = vld [vmem:[#allocation7 + $0x30] sm:$0xff]  ;;  %v299_v27 = vsub.s32 %v296_v22, %v511_v7 }
  0x3a   :  { %349 = vmatpush3.msra.mxu0 %v69_v31  ;;  %233 = vmatpush1.msra.mxu1 %v195_v44  ;;  %v182_v2 = vld [vmem:[#allocation7 + $0x28] sm:$0xff]  ;;  %v181_v3 = vld [vmem:[#allocation7 + $0x20] sm:$0xff]  ;;  %v180_v4 = vld [vmem:[#allocation7 + $0x18] sm:$0xff] }
  0x3b   :  { %350 = vmatprep.subr.mxu0 %v84_v33  ;;  %234 = vmatprep.subr.mxu1 %v194_v46  ;;  %v179_v5 = vld [vmem:[#allocation7 + $0x10] sm:$0xff]  ;;  %v178_v6 = vld [vmem:[#allocation7 + $0x8] sm:$0xff]  ;;  %v177_v8 = vld [vmem:[#allocation7] sm:$0xff] }
  0x3c   :  { %351 = vmatpush3.msra.mxu0 %v68_v35  ;;  %235 = vmatpush1.msra.mxu1 %v193_v49  ;;  %v60_v11 = vld [vmem:[%s540_s2] sm:$0x1]  ;;  %s470_s2 = smov [#allocation8]  }
  0x3d   :  { %352 = vmatprep.subr.mxu0 %v83_v37  ;;  %236 = vmatprep.subr.mxu1 %v192_v51  ;;  %v61_v19 = vld [vmem:[%s542_s4] sm:$0x3]  ;;  %s320_s13 = sshll.u32 %s470_s2, 4  ;;  %s321_s13 = int_to_ptr.vmem [resolvable:$true] %s320_s13 }
  0x3e   :  { %353 = vmatpush3.msra.mxu0 %v67_v39  ;;  %237 = vmatpush1.msra.mxu1 %v191_v53  ;;  %v213_v20 = vrot.slane %v61_v19, %v98_v48  ;;  %v217_v21 = vrot.slane %v61_v19, %v102_v12  ;;  %s435_s4 = scalar_lea.vmem %s321_s13, 32  ;;  %p440_p2 = scmp.lt.s32.totalorder %s321_s13, %s321_s13 }
  0x3f   :  { %354 = vmatprep.subr.mxu0 %v82_v41  ;;  %238 = vmatprep.subr.mxu1 %v190_v55  ;;  %p436_p1 = scmp.ne.s32.totalorder %s321_s13, %s435_s4  ;;  %p441_p3 = scmp.lt.s32.totalorder %s435_s4, %s435_s4 }
  0x40   :  { %355 = vmatpush3.msra.mxu0 %v66_v43  ;;  %239 = vmatpush1.msra.mxu1 %v189_v58 }
  0x41   :  { %356 = vmatprep.subr.mxu0 %v81_v45  ;;  %240 = vmatprep.subr.mxu1 %v188_v59  ;;  %p442_p4 = por %p441_p3, %p440_p2 }
  0x42   :  { %357 = vmatpush3.msra.mxu0 %v65_v47  ;;  %241 = vmatpush1.msra.mxu1 %v187_v60 }
  0x43   :  { %358 = vmatprep.subr.mxu0 %v80_v50  ;;  %242 = vmatprep.subr.mxu1 %v186_v61  ;;  %p443_p5 = pnand %p442_p4, %p436_p1 }
  0x44   :  { %359 = vmatpush3.msra.mxu0 %v64_v52  ;;  %243 = vmatpush1.msra.mxu1 %v185_v62 }
  0x45   :  { %360 = vmatprep.subr.mxu0 %v79_v54  ;;  %244 = vmatprep.subr.mxu1 %v184_v63 }
  0x46   :  { %361 = vmatpush3.msra.mxu0 %v63_v56  ;;  %245 = vmatpush1.msra.mxu1 %v183_v1 }
  0x47   :  { %171 = vmatmul.mubr.f32.vlgmr.msra.gmra.mxu0 %v99_v57  ;;  %246 = vmatprep.subr.mxu1 %v182_v2 }
  0x48   :  { %247 = vmatpush1.msra.mxu1 %v181_v3  ;;  %284 = vmatprep.mubr.f32.mxu1 %v468_v9 }
  0x49   :  { %248 = vmatprep.subr.mxu1 %v180_v4 }
  0x4a   :  { %249 = vmatpush1.msra.mxu1 %v179_v5 }
  0x4b   :  { %250 = vmatprep.subr.mxu1 %v178_v6 }
  0x4c   :  { %251 = vmatpush1.msra.mxu1 %v177_v8 }
 0x107   :  { %v362_v10 = vpop.f32.mrf.mxu0 }
 0x109   :  { %v363_v13 = vpop.f32.mrf.mxu0 }
 0x10a   :  { %v364_v14 = vadd.f32 %v363_v13, %v362_v10 }
 0x10c   :  { %v173_v15 = vadd.f32 %v364_v14, %v60_v11 }
 0x10e   :  { %v176_v16 = vmax.f32 %v173_v15, 0.0 }
 0x110   :  { %285 = vmatmul.mubr.f32.vlgmr.msra.gmra.mxu1 %v176_v16 }
 0x1d0   :  { %v286_v23 = vpop.f32.mrf.mxu1 }
 0x1d1   :  { %v287_v25 = vadd.f32 %v286_v23, %v213_v20 }
 0x1d2   :  { %v288_v24 = vpop.f32.mrf.mxu1 }
 0x1d3   :  { %v289_v26 = vadd.f32 %v288_v24, %v217_v21 }
 0x1d5   :  { %v293_v28 = vcombine.low %v287_v25, %v289_v26 }
 0x1d7   :  { %v300_v29 = vrot.slane %v293_v28, %v299_v27 }
 0x1d9   :  { %v307_v30 = vrot.slane %v300_v29, %v299_v27 }
 0x1db   :  { %313 = vst.msk [vmem:[#allocation8] sm:$0x3] %vm311_vm0, %v307_v30 }
 0x1dc   :  { %446 = shalt.err (!%p443_p5)
}
 0x1dd   :  { %323 = dma.vmem_to_hbm [thread:$0]  %s321_s13, 32, %s543_s5, [#allocation4]  }
 0x1de   :  { %459 = dma.done.wait [#allocation4], 32  }
 0x1df   :  { %460 = vsyncadd [#allocation4], 4294967264 }
 0x1e0   :  { %327 = vsyncpa [#allocation3], 1 }
 0x1e1   :  { %328 = vsyncpa [#allocation6], 1 }
 0x1e2   :  { %329 = vsyncpa [#allocation4], 1 }

</bundles_post_ra>
